<compile_context>
chip_gen: v7x
topology: tpu7x:2x2x1
jax: 0.10.0
libtpu: 0.0.40
codegen_flags: <defaults>
</compile_context>

<pallas_src>
import jax
import jax.numpy as jnp
from jax.experimental import pallas as pl
from jax.experimental.pallas import tpu as pltpu

_IN = 6
_HIDDEN = 100
_IN_PAD = 8          # 6 features padded to a full 8-sublane tile
_HID_PAD = 104       # 100 hidden + 3 zero rows + 1 constant-1 row (multiple of 8)
_ONE_ROW = _HID_PAD - 1


def _mlp_kernel(x_ref, w1_ref, b1_ref, w2_ref, o_ref):
    # x_ref : (8,   TILE_B)  features on sublanes (rows 6..7 zero), batch on lanes
    # w1_ref: (104, 8)       zero-padded W1; row 103 all-zero
    # b1_ref: (104, 1)       zero-padded b1; row 103 == 1 -> constant-1 hidden row
    # w2_ref: (1,   104)     zero-padded W2; col 103 == b2 (fc2 bias fused)
    # o_ref : (1,   TILE_B)  lane-dense output tile
    h = jnp.dot(w1_ref[...], x_ref[...], preferred_element_type=jnp.float32)  # (104, TILE_B)
    h = jnp.maximum(h + b1_ref[...], 0.0)   # fc1 bias + ReLU; relu(1) == 1 keeps the bias row
    y = jnp.dot(w2_ref[...], h, preferred_element_type=jnp.float32)           # (1, TILE_B)
    o_ref[...] = y.astype(o_ref.dtype)


def _round_up(n, m):
    return (n + m - 1) // m * m


def _pick_tiling(batch, tile_req):
    """Lane-dense batch tiling: tile_b multiple of 128, >=2 grid steps when possible."""
    b128 = _round_up(max(batch, 1), 128)
    n_steps = max(1, -(-b128 // max(128, tile_req)))      # ceil(b128 / tile_req)
    if b128 >= 256:
        n_steps = max(n_steps, 2)                          # use both TCs on v7x
    tile_b = _round_up(-(-b128 // n_steps), 128)           # minimize lane padding
    return tile_b, n_steps * tile_b, n_steps


def _net_forward(x, w1, b1, w2, b2, *, tile_b=8192):
    """Forward pass of Net.

    x : (B, 6) float32
    w1: (100, 6), b1: (100,)   -- PyTorch nn.Linear convention (out, in)
    w2: (1, 100), b2: (1,)
    returns (B, 1) float32
    """
    B = x.shape[0]
    tile_b, b_pad, n_steps = _pick_tiling(B, int(tile_b))

    # ---- one-off layout plumbing (fused by the surrounding jit) ----
    x_t = jnp.pad(x.astype(jnp.float32).T,
                  ((0, _IN_PAD - _IN), (0, b_pad - B)))              # (8, B_pad)

    w1_pad = jnp.zeros((_HID_PAD, _IN_PAD), jnp.float32)
    w1_pad = w1_pad.at[:_HIDDEN, :_IN].set(w1.astype(jnp.float32))   # (104, 8)

    b1_pad = jnp.zeros((_HID_PAD, 1), jnp.float32)
    b1_pad = b1_pad.at[:_HIDDEN, 0].set(b1.astype(jnp.float32))
    b1_pad = b1_pad.at[_ONE_ROW, 0].set(1.0)                         # constant-1 hidden row

    w2_pad = jnp.zeros((1, _HID_PAD), jnp.float32)
    w2_pad = w2_pad.at[0, :_HIDDEN].set(w2.reshape(-1).astype(jnp.float32))
    w2_pad = w2_pad.at[0, _ONE_ROW].set(b2.reshape(()).astype(jnp.float32))   # fc2 bias fused

    # Rough VMEM need: double-buffered x/out blocks + resident weights + (104, tile_b) h.
    vmem_est = 2 * (_IN_PAD + 1) * tile_b * 4 + _HID_PAD * tile_b * 4 + (1 << 20)
    cp = dict(dimension_semantics=("parallel",))
    if vmem_est > (12 << 20):   # only for very large tile sweeps (v5e default scoped VMEM: 16 MiB)
        cp["vmem_limit_bytes"] = int(min(2 * vmem_est, 100 << 20))

    out = pl.pallas_call(
        _mlp_kernel,
        out_shape=jax.ShapeDtypeStruct((1, b_pad), jnp.float32),
        grid=(n_steps,),
        in_specs=[
            # x tiles stream through VMEM, double-buffered by the BlockSpec pipeline.
            pl.BlockSpec((_IN_PAD, tile_b), lambda i: (0, i)),
            # Weights/bias: constant block index -> DMA'd once, VMEM-resident across the grid.
            pl.BlockSpec((_HID_PAD, _IN_PAD), lambda i: (0, 0)),
            pl.BlockSpec((_HID_PAD, 1), lambda i: (0, 0)),
            pl.BlockSpec((1, _HID_PAD), lambda i: (0, 0)),
        ],
        out_specs=pl.BlockSpec((1, tile_b), lambda i: (0, i)),
        compiler_params=pltpu.CompilerParams(**cp),
    )(x_t, w1_pad, b1_pad, w2_pad)

    # Drop lane padding, return in the PyTorch (B, 1) convention.
    return out[:, :B].T


net_forward = jax.jit(_net_forward, static_argnames=("tile_b",))


if __name__ == "__main__":
    key = jax.random.PRNGKey(0)
    k_x, k1, k2, k3, k4 = jax.random.split(key, 5)

    # Deterministic nn.Linear-style init: U(-1/sqrt(fan_in), 1/sqrt(fan_in)), weights (out, in).
    bound1 = 1.0 / jnp.sqrt(float(_IN))
    bound2 = 1.0 / jnp.sqrt(float(_HIDDEN))
    w1 = jax.random.uniform(k1, (_HIDDEN, _IN), jnp.float32, -bound1, bound1)
    b1 = jax.random.uniform(k2, (_HIDDEN,), jnp.float32, -bound1, bound1)
    w2 = jax.random.uniform(k3, (1, _HIDDEN), jnp.float32, -bound2, bound2)
    b2 = jax.random.uniform(k4, (1,), jnp.float32, -bound2, bound2)

    def ref_fn(xb):
        return jnp.maximum(xb @ w1.T + b1, 0.0) @ w2.T + b2

    # Small batch (single tile) and a non-multiple-of-128 batch (2-step grid + padding).
    for batch in (8, 300):
        xb = jax.random.normal(jax.random.fold_in(k_x, batch), (batch, _IN), jnp.float32)
        out = net_forward(xb, w1, b1, w2, b2)
        jax.block_until_ready(out)
        ref = ref_fn(xb)
        assert out.shape == (batch, 1), out.shape
        err = jnp.max(jnp.abs(out - ref))
        assert jnp.allclose(out, ref, atol=1e-4, rtol=1e-4), (
            f"B={batch} max abs err {err}")

    print("KERNEL_OK")
</pallas_src>

<mosaic_0001>
module attributes {stable_mosaic.version = 11 : i64} {
  func.func @_mlp_kernel(%arg0: i32, %arg1: memref<8x128xf32, #tpu.memory_space<vmem>>, %arg2: memref<104x8xf32, #tpu.memory_space<vmem>>, %arg3: memref<104x1xf32, #tpu.memory_space<vmem>>, %arg4: memref<1x104xf32, #tpu.memory_space<vmem>>, %arg5: memref<1x128xf32, #tpu.memory_space<vmem>>) attributes {dimension_semantics = [#tpu.dimension_semantics<parallel>], iteration_bounds = array<i64: 1>, scalar_prefetch = 0 : i64, scratch_operands = 0 : i64, tpu.core_type = #tpu.core_type<tc>, window_params = [{transform_indices = @transform_0, window_bounds = array<i64: 8, 128>}, {pipeline_mode = #tpu.pipeline_mode<synchronous>, transform_indices = @transform_1, window_bounds = array<i64: 104, 8>}, {pipeline_mode = #tpu.pipeline_mode<synchronous>, transform_indices = @transform_2, window_bounds = array<i64: 104, 1>}, {pipeline_mode = #tpu.pipeline_mode<synchronous>, transform_indices = @transform_3, window_bounds = array<i64: 1, 104>}, {transform_indices = @transform_4, window_bounds = array<i64: 1, 128>}]} {
    %c0 = arith.constant 0 : index
    %c0_0 = arith.constant 0 : index
    %0 = vector.load %arg2[%c0, %c0_0] : memref<104x8xf32, #tpu.memory_space<vmem>>, vector<104x8xf32>
    %c0_1 = arith.constant 0 : index
    %c0_2 = arith.constant 0 : index
    %1 = vector.load %arg1[%c0_1, %c0_2] : memref<8x128xf32, #tpu.memory_space<vmem>>, vector<8x128xf32>
    %cst = arith.constant dense<0.000000e+00> : vector<104x128xf32>
    %2 = tpu.matmul %0, %1, %cst {dimension_numbers = #tpu.dot_dimension_numbers<[1], [0], [0], [1], [0, 0, 1, 1], [], []>} : vector<104x8xf32>, vector<8x128xf32>, vector<104x128xf32> -> vector<104x128xf32>
    %c0_3 = arith.constant 0 : index
    %c0_4 = arith.constant 0 : index
    %3 = vector.load %arg3[%c0_3, %c0_4] : memref<104x1xf32, #tpu.memory_space<vmem>>, vector<104x1xf32>
    %4 = vector.broadcast %3 : vector<104x1xf32> to vector<104x128xf32>
    %5 = arith.addf %2, %4 : vector<104x128xf32>
    %cst_5 = arith.constant 0.000000e+00 : f32
    %6 = vector.broadcast %cst_5 : f32 to vector<104x128xf32>
    %7 = arith.maximumf %5, %6 : vector<104x128xf32>
    %c0_6 = arith.constant 0 : index
    %c0_7 = arith.constant 0 : index
    %8 = vector.load %arg4[%c0_6, %c0_7] : memref<1x104xf32, #tpu.memory_space<vmem>>, vector<1x104xf32>
    %cst_8 = arith.constant dense<0.000000e+00> : vector<1x128xf32>
    %9 = tpu.matmul %8, %7, %cst_8 {dimension_numbers = #tpu.dot_dimension_numbers<[1], [0], [0], [1], [0, 0, 1, 1], [], []>} : vector<1x104xf32>, vector<104x128xf32>, vector<1x128xf32> -> vector<1x128xf32>
    %c0_9 = arith.constant 0 : index
    %c0_10 = arith.constant 0 : index
    %10 = vector.load %arg5[%c0_9, %c0_10] : memref<1x128xf32, #tpu.memory_space<vmem>>, vector<1x128xf32>
    tpu.vector_store %arg5[%c0_9, %c0_10], %9 {strides = array<i32>} : memref<1x128xf32, #tpu.memory_space<vmem>>, vector<1x128xf32>,
    return
  }
  func.func @transform_0(%arg0: i32) -> (i32, i32) {
    %c0_i32 = arith.constant 0 : i32
    %c0_i32_0 = arith.constant 0 : i32
    return %c0_i32, %arg0 : i32, i32
  }
  func.func @transform_1(%arg0: i32) -> (i32, i32) {
    %c0_i32 = arith.constant 0 : i32
    %c0_i32_0 = arith.constant 0 : i32
    %c0_i32_1 = arith.constant 0 : i32
    return %c0_i32, %c0_i32_0 : i32, i32
  }
  func.func @transform_2(%arg0: i32) -> (i32, i32) {
    %c0_i32 = arith.constant 0 : i32
    %c0_i32_0 = arith.constant 0 : i32
    %c0_i32_1 = arith.constant 0 : i32
    return %c0_i32, %c0_i32_0 : i32, i32
  }
  func.func @transform_3(%arg0: i32) -> (i32, i32) {
    %c0_i32 = arith.constant 0 : i32
    %c0_i32_0 = arith.constant 0 : i32
    %c0_i32_1 = arith.constant 0 : i32
    return %c0_i32, %c0_i32_0 : i32, i32
  }
  func.func @transform_4(%arg0: i32) -> (i32, i32) {
    %c0_i32 = arith.constant 0 : i32
    %c0_i32_0 = arith.constant 0 : i32
    return %c0_i32, %arg0 : i32, i32
  }
}

</mosaic_0001>

<bundles_post_ra>
// kernel: _net_forward.1
= control target key start
LH: loop header
LB: loop body
LE: loop exit
PB: predicated region body
PF: predicated region fallthrough
CT: control target
= control target key end

     0   :  { %vm109_vm0 = vcmask 64512   ;;  %v508_v0 = vmov 0.0   ;;  %vm509_vm1 = vmmov 0   ;;  %v510_v3 = vmov 0   ;;  %s673_s0 = inlined_call_operand.vmem [shape: f32[8,128], index: 0, kind: input, shape index: {}]   ;;  %s674_s1 = inlined_call_operand.vmem [shape: f32[104,8], index: 1, kind: input, shape index: {}]   ;;  %s675_s2 = inlined_call_operand.vmem [shape: f32[104,1], index: 2, kind: input, shape index: {}]   ;;  %s676_s3 = inlined_call_operand.vmem [shape: f32[1,104], index: 3, kind: input, shape index: {}]   ;;  %s677_s4 = inlined_call_operand.vmem [shape: f32[1,128], index: 4, kind: output, shape index: {}]  }
   0x1   :  { %414 = vmatprep.subr.mxu0 %v508_v0  ;;  %v30_v1 = vld [vmem:[%s673_s0] sm:$0xff]  ;;  %416 = vmatprep.mubr.msk.f32.mxu0 %vm509_vm1, %v508_v0  ;;  %v18_v4 = vld [vmem:[%s674_s1 + $0x8] sm:$0xff]  ;;  %v33_v6 = vld [vmem:[%s675_s2 + $0x10] sm:$0xff]  ;;  %v511_v29 = vmov 0.0|0.0   ;;  %vm293_vm2 = vcmask 850944  }
   0x2   :  { %v17_v2 = vld [vmem:[%s674_s1] sm:$0xff]  ;;  %415 = vmatpush3.msra.mxu0 %v30_v1  ;;  %506 = vset.pattern.permute.xlu0 %v510_v3  ;;  %v32_v7 = vld [vmem:[%s675_s2 + $0x8] sm:$0xff]  ;;  %v19_v8 = vld [vmem:[%s674_s1 + $0x10] sm:$0xff] }
   0x3   :  { %417 = vmatmul.mubr.msk.f32.vlgmr.msra.gmra.mrb[0].mxu0 %vm109_vm0, %v17_v2  ;;  %507 = vset.pattern.permute.xlu1 %v510_v3  ;;  %v31_v5 = vld [vmem:[%s675_s2] sm:$0xff]  ;;  %v34_v9 = vld [vmem:[%s675_s2 + $0x18] sm:$0xff]  ;;  %v36_v12 = vld [vmem:[%s675_s2 + $0x28] sm:$0xff] }
   0x4   :  { %419 = vmatprep.mubr.msk.f32.mxu0 %vm509_vm1, %v508_v0  ;;  %481 = vmatprep.mubr.msk.f32.mxu1 %vm509_vm1, %v508_v0  ;;  %v35_v10 = vld [vmem:[%s675_s2 + $0x20] sm:$0xff]  ;;  %v20_v11 = vld [vmem:[%s674_s1 + $0x18] sm:$0xff]  ;;  %v37_v13 = vld [vmem:[%s675_s2 + $0x30] sm:$0xff] }
   0x5   :  { %46 = vperm.xlu0 %506, %v31_v5   ;;  %56 = vperm.xlu1 %507, %v33_v6   ;;  %v21_v14 = vld [vmem:[%s674_s1 + $0x20] sm:$0xff]  ;;  %v38_v15 = vld [vmem:[%s675_s2 + $0x38] sm:$0xff]  ;;  %v22_v17 = vld [vmem:[%s674_s1 + $0x28] sm:$0xff] }
   0x6   :  { %v39_v16 = vld [vmem:[%s675_s2 + $0x40] sm:$0xff]  ;;  %v40_v18 = vld [vmem:[%s675_s2 + $0x48] sm:$0xff]  ;;  %v41_v19 = vld [vmem:[%s675_s2 + $0x50] sm:$0xff]  ;;  %484 = vmatprep.subr.bf16.mxu1 %v511_v29 }
   0x7   :  { %420 = vmatmul.mubr.msk.f32.gmra.mrb[2].mxu0 %vm109_vm0, %v18_v4  ;;  %v23_v20 = vld [vmem:[%s674_s1 + $0x30] sm:$0xff]  ;;  %v42_v21 = vld [vmem:[%s675_s2 + $0x58] sm:$0xff]  ;;  %v43_v22 = vld [vmem:[%s675_s2 + $0x60] sm:$0xff] }
   0x8   :  { %422 = vmatprep.mubr.msk.f32.mxu0 %vm509_vm1, %v508_v0  ;;  %v24_v23 = vld [vmem:[%s674_s1 + $0x38] sm:$0xff]  ;;  %v25_v24 = vld [vmem:[%s674_s1 + $0x40] sm:$0xff]  ;;  %v26_v25 = vld [vmem:[%s674_s1 + $0x48] sm:$0xff] }
   0x9   :  { %51 = vperm.xlu0 %506, %v32_v7   ;;  %61 = vperm.xlu1 %507, %v34_v9   ;;  %v27_v26 = vld [vmem:[%s674_s1 + $0x50] sm:$0xff]  ;;  %v28_v27 = vld [vmem:[%s674_s1 + $0x58] sm:$0xff]  ;;  %v29_v28 = vld [vmem:[%s674_s1 + $0x60] sm:$0xff] }
   0xb   :  { %423 = vmatmul.mubr.msk.f32.gmra.mrb[4].mxu0 %vm109_vm0, %v19_v8 }
   0xc   :  { %425 = vmatprep.mubr.msk.f32.mxu0 %vm509_vm1, %v508_v0 }
   0xd   :  { %66 = vperm.xlu0 %506, %v35_v10   ;;  %71 = vperm.xlu1 %507, %v36_v12  }
   0xf   :  { %426 = vmatmul.mubr.msk.f32.gmra.mrb[6].mxu0 %vm109_vm0, %v20_v11 }
  0x10   :  { %428 = vmatprep.mubr.msk.f32.mxu0 %vm509_vm1, %v508_v0 }
  0x11   :  { %76 = vperm.xlu0 %506, %v37_v13   ;;  %81 = vperm.xlu1 %507, %v38_v15  }
  0x13   :  { %429 = vmatmul.mubr.msk.f32.gmra.mrb[8].mxu0 %vm109_vm0, %v21_v14 }
  0x14   :  { %431 = vmatprep.mubr.msk.f32.mxu0 %vm509_vm1, %v508_v0 }
  0x15   :  { %86 = vperm.xlu0 %506, %v39_v16   ;;  %91 = vperm.xlu1 %507, %v40_v18  }
  0x17   :  { %432 = vmatmul.mubr.msk.f32.gmra.mrb[10].mxu0 %vm109_vm0, %v22_v17 }
  0x18   :  { %434 = vmatprep.mubr.msk.f32.mxu0 %vm509_vm1, %v508_v0 }
  0x19   :  { %96 = vperm.xlu0 %506, %v41_v19   ;;  %101 = vperm.xlu1 %507, %v42_v21  }
  0x1b   :  { %435 = vmatmul.mubr.msk.f32.gmra.mrb[12].mxu0 %vm109_vm0, %v23_v20 }
  0x1c   :  { %437 = vmatprep.mubr.msk.f32.mxu0 %vm509_vm1, %v508_v0 }
  0x1d   :  { %106 = vperm.xlu0 %506, %v43_v22  }
  0x1f   :  { %438 = vmatmul.mubr.msk.f32.gmra.mrb[14].mxu0 %vm109_vm0, %v24_v23 }
  0x20   :  { %440 = vmatprep.mubr.msk.f32.mxu0 %vm509_vm1, %v508_v0 }
  0x23   :  { %441 = vmatmul.mubr.msk.f32.gmra.mrb[16].mxu0 %vm109_vm0, %v25_v24 }
  0x24   :  { %443 = vmatprep.mubr.msk.f32.mxu0 %vm509_vm1, %v508_v0 }
  0x27   :  { %444 = vmatmul.mubr.msk.f32.gmra.mrb[18].mxu0 %vm109_vm0, %v26_v25 }
  0x28   :  { %446 = vmatprep.mubr.msk.f32.mxu0 %vm509_vm1, %v508_v0 }
  0x2b   :  { %447 = vmatmul.mubr.msk.f32.gmra.mrb[20].mxu0 %vm109_vm0, %v27_v26 }
  0x2c   :  { %449 = vmatprep.mubr.msk.f32.mxu0 %vm509_vm1, %v508_v0 }
  0x2f   :  { %450 = vmatmul.mubr.msk.f32.gmra.mrb[22].mxu0 %vm109_vm0, %v28_v27 }
  0x30   :  { %452 = vmatprep.mubr.msk.f32.mxu0 %vm509_vm1, %v508_v0 }
  0x33   :  { %453 = vmatmul.mubr.msk.f32.gmra.mrb[24].mxu0 %vm109_vm0, %v29_v28 }
  0x84   :  { %v47_v30 = vpop.permute.xlu0 %46  ;;  %v57_v38 = vpop.permute.xlu1 %56 }
  0x88   :  { %v52_v34 = vpop.permute.xlu0 %51  ;;  %v62_v45 = vpop.permute.xlu1 %61 }
  0x8c   :  { %v67_v54 = vpop.permute.xlu0 %66  ;;  %v72_v56 = vpop.permute.xlu1 %71 }
  0x90   :  { %v77_v2 = vpop.permute.xlu0 %76  ;;  %v82_v4 = vpop.permute.xlu1 %81 }
  0x94   :  { %v87_v13 = vpop.permute.xlu0 %86  ;;  %v92_v15 = vpop.permute.xlu1 %91 }
  0x98   :  { %v97_v24 = vpop.permute.xlu0 %96  ;;  %v102_v26 = vpop.permute.xlu1 %101 }
  0xd6   :  { %v215_v31 = vpop.f32.mrb[0].mxu0 }
  0xd7   :  { %v418_v32 = vpop.f32.mrb[1].mxu0  ;;  %v216_v33 = vadd.f32 %v215_v31, %v47_v30 }
  0xd9   :  { %v279_v39 = vmax.f32 %v216_v33, 0.0  ;;  %v107_v33 = vpop.permute.xlu0 %106 }
  0xda   :  { %v220_v35 = vpop.f32.mrb[2].mxu0 }
  0xdb   :  { %v221_v36 = vadd.f32 %v220_v35, %v52_v34  ;;  %v421_v37 = vpop.f32.mrb[3].mxu0 }
  0xdd   :  { %v280_v40 = vmax.f32 %v221_v36, 0.0 }
  0xde   :  { %v225_v41 = vpop.f32.mrb[4].mxu0 }
  0xdf   :  { %v424_v42 = vpop.f32.mrb[5].mxu0  ;;  %v485_v43 = vpack.c.bf16 %v280_v40, %v279_v39  ;;  %v226_v44 = vadd.f32 %v225_v41, %v57_v38  ;;  %v292_v39 = vld [vmem:[%s676_s3] sm:$0x1] }
  0xe1   :  { %486 = vmatpush3.bf16.msra.mxu1 %v485_v43  ;;  %v281_v49 = vmax.f32 %v226_v44, 0.0 }
  0xe2   :  { %v230_v46 = vpop.f32.mrb[6].mxu0  ;;  %487 = vmatprep.subr.bf16.mxu1 %v511_v29 }
  0xe3   :  { %v231_v47 = vadd.f32 %v230_v46, %v62_v45  ;;  %v427_v48 = vpop.f32.mrb[7].mxu0 }
  0xe5   :  { %v282_v50 = vmax.f32 %v231_v47, 0.0 }
  0xe6   :  { %v235_v51 = vpop.f32.mrb[8].mxu0 }
  0xe7   :  { %v488_v52 = vpack.c.bf16 %v282_v50, %v281_v49  ;;  %v430_v53 = vpop.f32.mrb[9].mxu0  ;;  %v236_v55 = vadd.f32 %v235_v51, %v67_v54 }
  0xe9   :  { %489 = vmatpush3.bf16.msra.mxu1 %v488_v52  ;;  %v283_v60 = vmax.f32 %v236_v55, 0.0 }
  0xea   :  { %v240_v57 = vpop.f32.mrb[10].mxu0  ;;  %490 = vmatprep.subr.bf16.mxu1 %v511_v29 }
  0xeb   :  { %v241_v58 = vadd.f32 %v240_v57, %v72_v56  ;;  %v433_v59 = vpop.f32.mrb[11].mxu0 }
  0xed   :  { %v284_v61 = vmax.f32 %v241_v58, 0.0 }
  0xee   :  { %v245_v62 = vpop.f32.mrb[12].mxu0 }
  0xef   :  { %v491_v63 = vpack.c.bf16 %v284_v61, %v283_v60  ;;  %v436_v1 = vpop.f32.mrb[13].mxu0  ;;  %v246_v3 = vadd.f32 %v245_v62, %v77_v2 }
  0xf1   :  { %492 = vmatpush3.bf16.msra.mxu1 %v491_v63  ;;  %v285_v8 = vmax.f32 %v246_v3, 0.0 }
  0xf2   :  { %v250_v5 = vpop.f32.mrb[14].mxu0  ;;  %493 = vmatprep.subr.bf16.mxu1 %v511_v29 }
  0xf3   :  { %v251_v6 = vadd.f32 %v250_v5, %v82_v4  ;;  %v439_v7 = vpop.f32.mrb[15].mxu0 }
  0xf5   :  { %v286_v9 = vmax.f32 %v251_v6, 0.0 }
  0xf6   :  { %v255_v10 = vpop.f32.mrb[16].mxu0 }
  0xf7   :  { %v494_v11 = vpack.c.bf16 %v286_v9, %v285_v8  ;;  %v442_v12 = vpop.f32.mrb[17].mxu0  ;;  %v256_v14 = vadd.f32 %v255_v10, %v87_v13 }
  0xf9   :  { %495 = vmatpush3.bf16.msra.mxu1 %v494_v11  ;;  %v287_v19 = vmax.f32 %v256_v14, 0.0 }
  0xfa   :  { %v260_v16 = vpop.f32.mrb[18].mxu0  ;;  %496 = vmatprep.subr.bf16.mxu1 %v511_v29 }
  0xfb   :  { %v261_v17 = vadd.f32 %v260_v16, %v92_v15  ;;  %v445_v18 = vpop.f32.mrb[19].mxu0 }
  0xfd   :  { %v288_v20 = vmax.f32 %v261_v17, 0.0 }
  0xfe   :  { %v265_v21 = vpop.f32.mrb[20].mxu0 }
  0xff   :  { %v497_v22 = vpack.c.bf16 %v288_v20, %v287_v19  ;;  %v448_v23 = vpop.f32.mrb[21].mxu0  ;;  %v266_v25 = vadd.f32 %v265_v21, %v97_v24 }
 0x101   :  { %498 = vmatpush3.bf16.msra.mxu1 %v497_v22  ;;  %v289_v31 = vmax.f32 %v266_v25, 0.0 }
 0x102   :  { %v270_v27 = vpop.f32.mrb[22].mxu0  ;;  %499 = vmatprep.subr.bf16.mxu1 %v511_v29 }
 0x103   :  { %v271_v28 = vadd.f32 %v270_v27, %v102_v26  ;;  %v451_v30 = vpop.f32.mrb[23].mxu0 }
 0x105   :  { %v290_v32 = vmax.f32 %v271_v28, 0.0 }
 0x106   :  { %v275_v34 = vpop.f32.mrb[24].mxu0 }
 0x107   :  { %v500_v35 = vpack.c.bf16 %v290_v32, %v289_v31  ;;  %v276_v36 = vadd.f32 %v275_v34, %v107_v33  ;;  %v454_v37 = vpop.f32.mrb[25].mxu0 }
 0x109   :  { %501 = vmatpush3.bf16.msra.mxu1 %v500_v35  ;;  %v291_v38 = vmax.f32 %v276_v36, 0.0 }
 0x10a   :  { %479 = vmatprep.subr.mxu1 %v508_v0 }
 0x10d   :  { %480 = vmatpush3.msra.mxu1 %v291_v38 }
 0x10e   :  { %482 = vmatmul.mubr.msk.f32.vlgmr.msra.gmra.mrb[0].mxu1 %vm293_vm2, %v292_v39 }
 0x1e1   :  { %v363_v29 = vpop.f32.mrb[0].mxu1 }
 0x1e2   :  { %367 = vst [vmem:[%s677_s4] sm:$0x1] %v363_v29  ;;  %v483_v40 = vpop.f32.mrb[1].mxu1 }

</bundles_post_ra>
